<compile_context>
chip_gen: v7x
topology: tpu7x:2x2x1
jax: 0.10.0
libtpu: 0.0.40
codegen_flags: <defaults>
</compile_context>

<pallas_src>
import jax
import jax.numpy as jnp
from jax.experimental import pallas as pl
from jax.experimental.pallas import tpu as pltpu


def _flp_context_kernel(dist_ref, orig_ref, emb_ref, out_ref):
    # dist_ref: (TB, N)     current distance per customer
    # orig_ref: (TB, N, N)  orig_distances[b, i, j]
    # emb_ref : (TB, N, D)  node embeddings
    # out_ref : (TB, D)     softmax-weighted embedding
    dist = dist_ref[...].astype(jnp.float32)          # (TB, N)
    orig = orig_ref[...].astype(jnp.float32)          # (TB, N, N)
    emb = emb_ref[...].astype(jnp.float32)            # (TB, N, D)

    # dist_improve[b, i] = sum_j relu(dist[b, j] - orig[b, i, j])
    improve = jnp.maximum(dist[:, None, :] - orig, 0.0)   # (TB, N, N)
    di = jnp.sum(improve, axis=-1)                         # (TB, N), lane-dense

    # softmax over the N locations (lane axis)
    m = jnp.max(di, axis=-1, keepdims=True)                # (TB, 1)
    e = jnp.exp(di - m)                                    # (TB, N)
    denom = jnp.sum(e, axis=-1, keepdims=True)             # (TB, 1)
    soft = e * pl.reciprocal(denom, approx=False)          # (TB, N) (exact: test tol 1e-5)

    # weighted sum of embeddings over locations -> (TB, D)
    out = jnp.sum(emb * soft[:, :, None], axis=1)
    out_ref[...] = out.astype(out_ref.dtype)


def _choose_tb(B, N, D, vmem_budget_bytes):
    """Pick a batch tile that (a) keeps double-buffered tiles inside a
    conservative VMEM budget and (b) satisfies the (8,128) sublane rule
    (TB == padded-B for a single block, or TB a multiple of 8)."""
    per_elem_bytes = 4 * (N * N + N * D + N + D)       # f32 bytes per batch element
    tb_cap = max(1, vmem_budget_bytes // (2 * per_elem_bytes))  # 2x for double-buffering
    if B <= tb_cap:
        return B
    return max(8, (min(tb_cap, B) // 8) * 8)


def flp_context_forward(embeddings, distances, orig_distances,
                        *, vmem_budget_bytes=12 * 1024 * 1024):
    """embeddings: (B, N, D); distances: (B, N); orig_distances: (B, N, N).
    Returns embed_best: (B, D)."""
    B, N, D = embeddings.shape
    assert distances.shape == (B, N)
    assert orig_distances.shape == (B, N, N)

    TB = _choose_tb(B, N, D, vmem_budget_bytes)
    num_blocks = -(-B // TB)
    Bp = num_blocks * TB
    if Bp != B:
        pad = Bp - B
        # Zero padding is safe: di=0 -> uniform softmax over zero embeddings -> 0 rows, dropped below.
        embeddings = jnp.pad(embeddings, ((0, pad), (0, 0), (0, 0)))
        distances = jnp.pad(distances, ((0, pad), (0, 0)))
        orig_distances = jnp.pad(orig_distances, ((0, pad), (0, 0), (0, 0)))

    out = pl.pallas_call(
        _flp_context_kernel,
        out_shape=jax.ShapeDtypeStruct((Bp, D), embeddings.dtype),
        grid_spec=pltpu.PrefetchScalarGridSpec(
            num_scalar_prefetch=0,
            grid=(num_blocks,),
            in_specs=[
                pl.BlockSpec((TB, N), lambda b: (b, 0)),
                pl.BlockSpec((TB, N, N), lambda b: (b, 0, 0)),
                pl.BlockSpec((TB, N, D), lambda b: (b, 0, 0)),
            ],
            out_specs=pl.BlockSpec((TB, D), lambda b: (b, 0)),
        ),
        compiler_params=pltpu.CompilerParams(
            dimension_semantics=("parallel",),
            vmem_limit_bytes=32 * 1024 * 1024,
        ),
    )(distances, orig_distances, embeddings)
    return out[:B]


def _init_unused_linear_params(key, embed_dim):
    """Deterministic init of the (unused-in-forward) Linear layers declared in __init__."""
    k1, k2, k3 = jax.random.split(key, 3)
    # project_context: Linear(embed_dim -> embed_dim, bias=False) -- never used in FLPContext.forward
    w_ctx = jax.random.normal(k1, (embed_dim, embed_dim), jnp.float32) * 0.02
    # projection: Linear(embed_dim -> embed_dim, bias=True) -- never used in FLPContext.forward
    w_proj = jax.random.normal(k2, (embed_dim, embed_dim), jnp.float32) * 0.02
    b_proj = jax.random.normal(k3, (embed_dim,), jnp.float32) * 0.02
    return {"project_context_w": w_ctx, "projection_w": w_proj, "projection_b": b_proj}


def _reference(embeddings, distances, orig_distances):
    cur_dist = distances[:, None, :]                                  # (B, 1, N)
    dist_improve = jnp.maximum(cur_dist - orig_distances, 0.0)        # (B, N, N)
    dist_improve = dist_improve.sum(-1)                               # (B, N)
    soft = jax.nn.softmax(dist_improve, axis=-1)                      # (B, N)
    return (embeddings * soft[..., None]).sum(-2)                     # (B, D)


if __name__ == "__main__":
    key = jax.random.PRNGKey(0)

    # --- Case 1: small shapes, single batch tile (TB == B) ---
    B, N, D = 2, 8, 32
    k_emb, k_dist, k_orig, k_params = jax.random.split(key, 4)
    embeddings = jax.random.normal(k_emb, (B, N, D), jnp.float32)
    distances = jax.random.uniform(k_dist, (B, N), jnp.float32, minval=0.0, maxval=2.0)
    orig_distances = jax.random.uniform(k_orig, (B, N, N), jnp.float32, minval=0.0, maxval=2.0)

    _params = _init_unused_linear_params(k_params, D)  # declared in __init__, unused in forward

    out = flp_context_forward(embeddings, distances, orig_distances)
    out = jax.block_until_ready(out)
    ref = _reference(embeddings, distances, orig_distances)
    assert out.shape == (B, D)
    assert jnp.allclose(out, ref, rtol=1e-5, atol=1e-5), "mismatch vs reference (case 1)"

    # --- Case 2: exercise the multi-block / padded-batch path (TB=8, B=10) ---
    B2, N2, D2 = 10, 16, 64
    k2a, k2b, k2c = jax.random.split(jax.random.PRNGKey(1), 3)
    emb2 = jax.random.normal(k2a, (B2, N2, D2), jnp.float32)
    dist2 = jax.random.uniform(k2b, (B2, N2), jnp.float32, minval=0.0, maxval=2.0)
    orig2 = jax.random.uniform(k2c, (B2, N2, N2), jnp.float32, minval=0.0, maxval=2.0)
    # tiny VMEM budget forces TB=8 -> two grid steps with one padded row block
    out2 = flp_context_forward(emb2, dist2, orig2, vmem_budget_bytes=8 * 2 * 4 * (N2 * N2 + N2 * D2 + N2 + D2))
    out2 = jax.block_until_ready(out2)
    ref2 = _reference(emb2, dist2, orig2)
    assert out2.shape == (B2, D2)
    assert jnp.allclose(out2, ref2, rtol=1e-5, atol=1e-5), "mismatch vs reference (case 2)"

    print("KERNEL_OK")
</pallas_src>

<mosaic_0001>
module attributes {stable_mosaic.version = 11 : i64} {
  func.func @_flp_context_kernel(%arg0: i32, %arg1: memref<2x8xf32, #tpu.memory_space<vmem>>, %arg2: memref<2x8x8xf32, #tpu.memory_space<vmem>>, %arg3: memref<2x8x32xf32, #tpu.memory_space<vmem>>, %arg4: memref<2x32xf32, #tpu.memory_space<vmem>>) attributes {dimension_semantics = [#tpu.dimension_semantics<parallel>], iteration_bounds = array<i64: 1>, scalar_prefetch = 0 : i64, scratch_operands = 0 : i64, tpu.core_type = #tpu.core_type<tc>, window_params = [{transform_indices = @transform_0, window_bounds = array<i64: 2, 8>}, {transform_indices = @transform_1, window_bounds = array<i64: 2, 8, 8>}, {transform_indices = @transform_2, window_bounds = array<i64: 2, 8, 32>}, {transform_indices = @transform_3, window_bounds = array<i64: 2, 32>}]} {
    %c0 = arith.constant 0 : index
    %c0_0 = arith.constant 0 : index
    %0 = vector.load %arg1[%c0, %c0_0] : memref<2x8xf32, #tpu.memory_space<vmem>>, vector<2x8xf32>
    %c0_1 = arith.constant 0 : index
    %c0_2 = arith.constant 0 : index
    %c0_3 = arith.constant 0 : index
    %1 = vector.load %arg2[%c0_1, %c0_2, %c0_3] : memref<2x8x8xf32, #tpu.memory_space<vmem>>, vector<2x8x8xf32>
    %c0_4 = arith.constant 0 : index
    %c0_5 = arith.constant 0 : index
    %c0_6 = arith.constant 0 : index
    %2 = vector.load %arg3[%c0_4, %c0_5, %c0_6] : memref<2x8x32xf32, #tpu.memory_space<vmem>>, vector<2x8x32xf32>
    %3 = vector.shape_cast %0 : vector<2x8xf32> to vector<2x1x8xf32>
    %4 = vector.broadcast %3 : vector<2x1x8xf32> to vector<2x8x8xf32>
    %5 = arith.subf %4, %1 : vector<2x8x8xf32>
    %cst = arith.constant 0.000000e+00 : f32
    %6 = vector.broadcast %cst : f32 to vector<2x8x8xf32>
    %7 = arith.maximumf %5, %6 : vector<2x8x8xf32>
    %cst_7 = arith.constant dense<0.000000e+00> : vector<2x8xf32>
    %8 = vector.multi_reduction <add>, %7, %cst_7 [2] : vector<2x8x8xf32> to vector<2x8xf32>
    %cst_8 = arith.constant dense<0xFF800000> : vector<2xf32>
    %9 = vector.multi_reduction <maximumf>, %8, %cst_8 [1] : vector<2x8xf32> to vector<2xf32>
    %10 = vector.shape_cast %9 : vector<2xf32> to vector<2x1xf32>
    %11 = vector.broadcast %10 : vector<2x1xf32> to vector<2x8xf32>
    %12 = arith.subf %8, %11 : vector<2x8xf32>
    %13 = math.exp %12 : vector<2x8xf32>
    %cst_9 = arith.constant dense<0.000000e+00> : vector<2xf32>
    %14 = vector.multi_reduction <add>, %13, %cst_9 [1] : vector<2x8xf32> to vector<2xf32>
    %15 = vector.shape_cast %14 : vector<2xf32> to vector<2x1xf32>
    %16 = tpu.reciprocal %15 : vector<2x1xf32> -> vector<2x1xf32>
    %17 = vector.broadcast %16 : vector<2x1xf32> to vector<2x8xf32>
    %18 = arith.mulf %13, %17 : vector<2x8xf32>
    %19 = vector.shape_cast %18 : vector<2x8xf32> to vector<2x8x1xf32>
    %20 = vector.broadcast %19 : vector<2x8x1xf32> to vector<2x8x32xf32>
    %21 = arith.mulf %2, %20 : vector<2x8x32xf32>
    %cst_10 = arith.constant dense<0.000000e+00> : vector<2x32xf32>
    %22 = vector.multi_reduction <add>, %21, %cst_10 [1] : vector<2x8x32xf32> to vector<2x32xf32>
    %c0_11 = arith.constant 0 : index
    %c0_12 = arith.constant 0 : index
    %23 = vector.load %arg4[%c0_11, %c0_12] : memref<2x32xf32, #tpu.memory_space<vmem>>, vector<2x32xf32>
    tpu.vector_store %arg4[%c0_11, %c0_12], %22 {strides = array<i32>} : memref<2x32xf32, #tpu.memory_space<vmem>>, vector<2x32xf32>,
    return
  }
  func.func @transform_0(%arg0: i32) -> (i32, i32) {
    %c0_i32 = arith.constant 0 : i32
    %c0_i32_0 = arith.constant 0 : i32
    return %arg0, %c0_i32 : i32, i32
  }
  func.func @transform_1(%arg0: i32) -> (i32, i32, i32) {
    %c0_i32 = arith.constant 0 : i32
    %c0_i32_0 = arith.constant 0 : i32
    %c0_i32_1 = arith.constant 0 : i32
    return %arg0, %c0_i32, %c0_i32_0 : i32, i32, i32
  }
  func.func @transform_2(%arg0: i32) -> (i32, i32, i32) {
    %c0_i32 = arith.constant 0 : i32
    %c0_i32_0 = arith.constant 0 : i32
    %c0_i32_1 = arith.constant 0 : i32
    return %arg0, %c0_i32, %c0_i32_0 : i32, i32, i32
  }
  func.func @transform_3(%arg0: i32) -> (i32, i32) {
    %c0_i32 = arith.constant 0 : i32
    %c0_i32_0 = arith.constant 0 : i32
    return %arg0, %c0_i32 : i32, i32
  }
}

</mosaic_0001>

<bundles_post_ra>
// kernel: tpu_custom_call.1
= control target key start
LH: loop header
LB: loop body
LE: loop exit
PB: predicated region body
PF: predicated region fallthrough
CT: control target
= control target key end

     0   :  { %8 = vsyncpa [#allocation3], 0  ;;  %s421_s0 = inlined_call_operand.hbm [shape: f32[2,8], index: 0, kind: input, shape index: {}]   ;;  %s422_s1 = inlined_call_operand.hbm [shape: f32[2,8,8], index: 1, kind: input, shape index: {}]   ;;  %s423_s2 = inlined_call_operand.hbm [shape: f32[2,8,32], index: 2, kind: input, shape index: {}]   ;;  %s424_s3 = inlined_call_operand.hbm [shape: f32[2,32], index: 3, kind: output, shape index: {}]  }
   0x1   :  { %9 = vsyncpa [#allocation6], 0 }
   0x2   :  { %10 = vsyncpa [#allocation4], 0  ;;  %s334_s12 = smov [#allocation5]   ;;  %s240_s16 = scalar_lea.hbm %s422_s1, 256 }
   0x3   :  { %s26_s13 = sshll.u32 %s334_s12, 4  ;;  %p241_p0 = scmp.ne.s32.totalorder %s422_s1, %s240_s16  ;;  %s27_s13 = int_to_ptr.vmem [resolvable:$true] %s26_s13 }
   0x4   :  { %p244_p1 = scmp.lt.u32.totalorder %s240_s16, %s422_s1 }
   0x6   :  { %p246_p2 = pnand %p244_p1, %p241_p0 }
   0x8   :  { %249 = shalt.err (!%p246_p2)
}
   0x9   :  { %s250_s21 = scalar_lea.vmem %s27_s13, 256  ;;  %p255_p4 = scmp.lt.s32.totalorder %s27_s13, %s27_s13 }
   0xa   :  { %p251_p3 = scmp.ne.s32.totalorder %s27_s13, %s250_s21  ;;  %p256_p5 = scmp.lt.s32.totalorder %s250_s21, %s250_s21 }
   0xc   :  { %p257_p6 = por %p256_p5, %p255_p4 }
   0xe   :  { %p258_p7 = pnand %p257_p6, %p251_p3 }
  0x10   :  { %261 = shalt.err (!%p258_p7)
}
  0x11   :  { %s335_s22 = smov 128   ;;  %s336_s23 = smov 8  }
  0x12   :  { %32 = dma.hbm_to_vmem [thread:$0]  %s422_s1, 256, %s27_s13, [#allocation6], %s335_s22, %s335_s22, %s336_s23  }
  0x13   :  { %s337_s26 = smov [#allocation2]   ;;  %s338_s28 = smov [#allocation7]  }
  0x14   :  { %s17_s27 = sshll.u32 %s337_s26, 4  ;;  %s38_s29 = sshll.u32 %s338_s28, 4  ;;  %s18_s27 = int_to_ptr.vmem [resolvable:$true] %s17_s27  ;;  %s39_s29 = int_to_ptr.vmem [resolvable:$true] %s38_s29 }
  0x15   :  { %s262_s5 = scalar_lea.hbm %s421_s0, 32 }
  0x16   :  { %p263_p8 = scmp.ne.s32.totalorder %s421_s0, %s262_s5  ;;  %p266_p9 = scmp.lt.u32.totalorder %s262_s5, %s421_s0 }
  0x18   :  { %p268_p10 = pnand %p266_p9, %p263_p8 }
  0x1a   :  { %271 = shalt.err (!%p268_p10)
}
  0x1b   :  { %s272_s1 = scalar_lea.vmem %s18_s27, 32  ;;  %p277_p12 = scmp.lt.s32.totalorder %s18_s27, %s18_s27 }
  0x1c   :  { %p273_p11 = scmp.ne.s32.totalorder %s18_s27, %s272_s1  ;;  %p278_p13 = scmp.lt.s32.totalorder %s272_s1, %s272_s1 }
  0x1e   :  { %p279_p0 = por %p278_p13, %p277_p12 }
  0x20   :  { %p280_p1 = pnand %p279_p0, %p273_p11 }
  0x22   :  { %283 = shalt.err (!%p280_p1)
}
  0x23   :  { %20 = dma.hbm_to_vmem [thread:$0]  %s421_s0, 32, %s18_s27, [#allocation3]  }
  0x24   :  { %s284_s14 = scalar_lea.hbm %s423_s2, 256 }
  0x25   :  { %p285_p2 = scmp.ne.s32.totalorder %s423_s2, %s284_s14  ;;  %p288_p3 = scmp.lt.u32.totalorder %s284_s14, %s423_s2 }
  0x27   :  { %p290_p4 = pnand %p288_p3, %p285_p2 }
  0x29   :  { %293 = shalt.err (!%p290_p4)
}
  0x2a   :  { %s294_s19 = scalar_lea.vmem %s39_s29, 256  ;;  %p299_p6 = scmp.lt.s32.totalorder %s39_s29, %s39_s29 }
  0x2b   :  { %p295_p5 = scmp.ne.s32.totalorder %s39_s29, %s294_s19  ;;  %p300_p7 = scmp.lt.s32.totalorder %s294_s19, %s294_s19 }
  0x2d   :  { %p301_p8 = por %p300_p7, %p299_p6 }
  0x2f   :  { %p302_p9 = pnand %p301_p8, %p295_p5 }
  0x31   :  { %305 = shalt.err (!%p302_p9)
}
  0x32   :  { %44 = dma.hbm_to_vmem [thread:$0]  %s423_s2, 256, %s39_s29, [#allocation6], %s335_s22, %s335_s22, %s336_s23  }
  0x33   :  { %328 = dma.done.wait [#allocation3], 32  }
  0x34   :  { %329 = vsyncadd [#allocation3], 4294967264 }
  0x35   :  { %330 = dma.done.wait [#allocation6], 512  }
  0x36   :  { %331 = vsyncadd [#allocation6], 4294966784  ;;  %v71_v0 = vlaneseq  ;;  %v339_v1 = vmov 1966171168   ;;  %v55_v12 = vld [vmem:[#allocation5] sm:$0xff]  ;;  %v56_v15 = vld [vmem:[#allocation5 + $0x8] sm:$0xff] }
  0x37   :  { %v69_v2 = vunpack.c.l.s4 %v339_v1  ;;  %v223_v9 = vld.sshfl [vmem:[#allocation2] sm:$0x11 pattern:$0x75316420]  ;;  %vm96_vm0 = vcmask 64512   ;;  %vm115_vm1 = vcmask 1041409  }
  0x38   :  { %v72_v3 = vshrl.u32 %v71_v0, 7  ;;  %v106_v4 = vand.u32 127, %v71_v0  ;;  %v67_v11 = vcombine.high %v223_v9, %v223_v9  ;;  %vm118_vm2 = vcmask 58368   ;;  %v57_v52 = vld [vmem:[#allocation7] sm:$0xff]  ;;  %v58_v55 = vld [vmem:[#allocation7 + $0x8] sm:$0xff]  ;;  %s341_s2 = smov [#allocation8]  }
  0x39   :  { %v70_v5 = vunpack.c.0.s8 %v69_v2  ;;  %v340_v29 = vmov 0   ;;  %vm186_vm3 = vcmask 261120   ;;  %s213_s21 = sshll.u32 %s341_s2, 4  ;;  %vm205_vm4 = vcmask 254976   ;;  %s214_s21 = int_to_ptr.vmem [resolvable:$true] %s213_s21 }
  0x3a   :  { %v109_v6 = vsub.s32 %v106_v4, %v72_v3  ;;  %v84_v8 = vsub.s32 0, %v72_v3  ;;  %233 = vset.pattern.permute.xlu0 %v340_v29  ;;  %232 = vset.pattern.permute.xlu1 %v340_v29  ;;  %v129_v30 = vsub.s32 1, %v72_v3  ;;  %s306_s22 = scalar_lea.vmem %s214_s21, 32  ;;  %p311_p11 = scmp.lt.s32.totalorder %s214_s21, %s214_s21 }
  0x3b   :  { %v73_v7 = vsub.s32 %v70_v5, %v72_v3  ;;  %p307_p10 = scmp.ne.s32.totalorder %s214_s21, %s306_s22  ;;  %p312_p12 = scmp.lt.s32.totalorder %s306_s22, %s306_s22 }
  0x3d   :  { %v74_v10 = vrot.slane %v223_v9, %v73_v7  ;;  %v81_v14 = vrot.slane %v67_v11, %v73_v7  ;;  %p313_p13 = por %p312_p12, %p311_p11 }
  0x3f   :  { %v85_v13 = vrot.slane %v74_v10, %v84_v8  ;;  %v89_v17 = vrot.slane %v81_v14, %v84_v8  ;;  %p314_p0 = pnand %p313_p13, %p307_p10 }
  0x41   :  { %v92_v16 = vsub.f32 %v85_v13, %v55_v12  ;;  %v93_v19 = vsub.f32 %v89_v17, %v56_v15 }
  0x43   :  { %v94_v18 = vmax.f32 %v92_v16, 0.0  ;;  %v95_v21 = vmax.f32 %v93_v19, 0.0 }
  0x45   :  { %v97_v20 = vsel %vm96_vm0, %v94_v18, 0.0  ;;  %v100_v22 = vsel %vm96_vm0, %v95_v21, 0.0 }
  0x46   :  { %98 = vadd.xlane.f32.xlu0 %v97_v20 }
  0x4a   :  { %101 = vadd.xlane.f32.xlu0 %v100_v22 }
  0xd3   :  { %v99_v23 = vpop.xlane.xlu0 %98 }
  0xd4   :  { %v110_v25 = vrot.slane %v99_v23, %v109_v6 }
  0xd7   :  { %v102_v24 = vpop.xlane.xlu0 %101 }
  0xd8   :  { %v114_v26 = vrot.slane %v102_v24, %v109_v6 }
  0xda   :  { %v116_v27 = vsel %vm115_vm1, %v114_v26, %v110_v25 }
  0xdb   :  { %v119_v28 = vsel %vm118_vm2, %v116_v27, -inf }
  0xdc   :  { %120 = vmax.xlane.f32.xlu1 %v119_v28 }
 0x169   :  { %v121_v31 = vpop.xlane.xlu1 %120 }
 0x16a   :  { %v126_v32 = vrot.slane %v121_v31, %v84_v8  ;;  %v130_v33 = vrot.slane %v121_v31, %v129_v30 }
 0x16c   :  { %v133_v34 = vsub.f32 %v99_v23, %v126_v32  ;;  %v134_v35 = vsub.f32 %v102_v24, %v130_v33 }
 0x16e   :  { %v135_v36 = vmul.f32 1.442695, %v133_v34  ;;  %v137_v37 = vmul.f32 1.442695, %v134_v35 }
 0x170   :  { %234 = vpow2.f32 %v135_v36 }
 0x171   :  { %236 = vpow2.f32 %v137_v37 }
 0x17a   :  { %v235_v38 = vpop.eup %234 }
 0x17b   :  { %v237_v39 = vpop.eup %236  ;;  %142 = vperm.xlu1 %232, %v235_v38  }
 0x17c   :  { %145 = vperm.xlu0 %233, %v237_v39  }
 0x1fa   :  { %v143_v40 = vpop.permute.xlu1 %142 }
 0x1fb   :  { %v146_v41 = vpop.permute.xlu0 %145  ;;  %v150_v42 = vrot.slane %v143_v40, %v109_v6 }
 0x1fc   :  { %v154_v43 = vrot.slane %v146_v41, %v109_v6 }
 0x1fe   :  { %v155_v44 = vsel %vm115_vm1, %v154_v43, %v150_v42 }
 0x1ff   :  { %v157_v45 = vsel %vm118_vm2, %v155_v44, 0.0 }
 0x200   :  { %158 = vadd.xlane.f32.xlu1 %v157_v45 }
 0x28d   :  { %v159_v46 = vpop.xlane.xlu1 %158 }
 0x28e   :  { %238 = vrcp.f32 %v159_v46 }
 0x298   :  { %v239_v47 = vpop.eup %238 }
 0x299   :  { %v165_v48 = vrot.slane %v239_v47, %v84_v8  ;;  %v169_v50 = vrot.slane %v239_v47, %v129_v30 }
 0x29b   :  { %v172_v49 = vmul.f32 %v235_v38, %v165_v48  ;;  %v173_v51 = vmul.f32 %v237_v39, %v169_v50 }
 0x29d   :  { %176 = vperm.xlu0 %233, %v172_v49  }
 0x2a1   :  { %181 = vperm.xlu0 %233, %v173_v51  }
 0x31c   :  { %v177_v53 = vpop.permute.xlu0 %176 }
 0x31d   :  { %v184_v54 = vmul.f32 %v177_v53, %v57_v52 }
 0x31f   :  { %v187_v56 = vsel %vm186_vm3, %v184_v54, 0.0 }
 0x320   :  { %v188_v57 = vrot.slane %v187_v56, 4  ;;  %v182_v58 = vpop.permute.xlu0 %181 }
 0x321   :  { %v185_v59 = vmul.f32 %v182_v58, %v58_v55 }
 0x322   :  { %v189_v60 = vadd.f32 %v188_v57, %v187_v56 }
 0x323   :  { %v194_v61 = vsel %vm186_vm3, %v185_v59, 0.0 }
 0x324   :  { %v190_v62 = vrot.slane %v189_v60, 2  ;;  %v195_v63 = vrot.slane %v194_v61, 4 }
 0x326   :  { %v191_v0 = vadd.f32 %v190_v62, %v189_v60  ;;  %v196_v1 = vadd.f32 %v195_v63, %v194_v61 }
 0x328   :  { %v197_v2 = vrot.slane %v196_v1, 2  ;;  %v192_v3 = vrot.slane %v191_v0, 1 }
 0x32a   :  { %v198_v4 = vadd.f32 %v197_v2, %v196_v1  ;;  %v193_v6 = vadd.f32 %v192_v3, %v191_v0 }
 0x32c   :  { %v199_v5 = vrot.slane %v198_v4, 1 }
 0x32e   :  { %v200_v7 = vadd.f32 %v199_v5, %v198_v4 }
 0x330   :  { %v203_v8 = vsel %vm115_vm1, %v200_v7, %v193_v6 }
 0x331   :  { %206 = vst.msk [vmem:[#allocation8] sm:$0x3] %vm205_vm4, %v203_v8 }
 0x332   :  { %317 = shalt.err (!%p314_p0)
}
 0x333   :  { %s318_s25 = scalar_lea.hbm %s424_s3, 32 }
 0x334   :  { %p319_p1 = scmp.ne.s32.totalorder %s424_s3, %s318_s25  ;;  %p322_p2 = scmp.lt.u32.totalorder %s318_s25, %s424_s3 }
 0x336   :  { %p324_p3 = pnand %p322_p2, %p319_p1 }
 0x338   :  { %327 = shalt.err (!%p324_p3)
}
 0x339   :  { %216 = dma.vmem_to_hbm [thread:$0]  %s214_s21, 32, %s424_s3, [#allocation4]  }
 0x33a   :  { %332 = dma.done.wait [#allocation4], 32  }
 0x33b   :  { %333 = vsyncadd [#allocation4], 4294967264 }
 0x33c   :  { %220 = vsyncpa [#allocation3], 1 }
 0x33d   :  { %221 = vsyncpa [#allocation6], 1 }
 0x33e   :  { %222 = vsyncpa [#allocation4], 1 }

</bundles_post_ra>
